<compile_context>
chip_gen: v5e
topology: v5e:2x2
jax: 0.10.0
libtpu: 0.0.40
codegen_flags: <defaults>
</compile_context>

<pallas_src>
import functools

import numpy as np
import jax
import jax.numpy as jnp
from jax import lax
from jax.experimental import pallas as pl
from jax.experimental.pallas import tpu as pltpu

SPEED_OF_LIGHT = 299792458.0


# ---------------------------------------------------------------------------
# Parameter construction (glue, numpy): mirrors forward_operator() in the
# reference module.  generate_directions is reproduced with a simple l/m/n
# grid so the operator can be built deterministically in-script.
# ---------------------------------------------------------------------------
def generate_directions(npixel, cellsize):
    lin = (np.arange(npixel) - npixel // 2) * cellsize
    l, m = np.meshgrid(lin, lin, indexing="ij")
    n = np.sqrt(np.clip(1.0 - l**2 - m**2, 0.0, None))
    return np.stack([l, m, n], axis=0)  # (3, npixel, npixel)


def forward_operator(uvw, freq, npixel, cellsize=None):
    wl = SPEED_OF_LIGHT / freq
    if cellsize is None:
        cellsize = np.min(wl) / (2 * np.max(uvw))
    lmn = generate_directions(npixel, cellsize).reshape(3, -1)
    uvw = uvw.reshape(-1, 3)
    return np.exp(-1j * (2 * np.pi / np.min(wl)) * uvw @ lmn)  # (nvis, npix2)


# ---------------------------------------------------------------------------
# Pallas kernel: whole unrolled iteration in a single invocation (operands
# fit comfortably in VMEM at these sizes; see TODO above for real sizes).
# ---------------------------------------------------------------------------
def unrolled_kernel(alpha_ref, ys_ref, wr_ref, wi_ref, gr_ref, gi_ref,
                    out_ref, *, depth, batch, nvis, npix2):
    ys = ys_ref[...]          # (2B, Vpad)   == [y_real; y_imag] (zero-padded)
    wr = wr_ref[...]          # (Vpad, Ppad) == W.weight.real (f32, padded)
    wi = wi_ref[...]          # (Vpad, Ppad) == W.weight.imag (f32, padded)
    gr = gr_ref[...]          # (Ppad, Ppad) == real(G),  bf16
    gi = gi_ref[...]          # (Ppad, Ppad) == imag(G),  bf16
    alpha = alpha_ref[0]      # scalar from SMEM

    two_b = ys.shape[0]
    ppad = wr.shape[1]
    inv_p = 1.0 / npix2       # un-padded pixel count
    inv_v = 1.0 / nvis        # un-padded visibility count

    # +1 on real-block rows, -1 on imag-block rows; hoisted to full width once
    # (the unrolled loop would otherwise re-emit the broadcast every use).
    row = lax.broadcasted_iota(jnp.int32, (two_b, 1), 0)
    sgn = jnp.broadcast_to(
        jnp.where(row < batch, 1.0, -1.0).astype(jnp.float32), (two_b, ppad))

    def swap(x):
        # Exchange real-block and imag-block rows: cheap XLU sublane rotation.
        return pltpu.roll(x, shift=batch, axis=0)

    # ---- one-time prologue (f32): x0 = Wt(y) = y @ conj(W) / npix2 ---------
    #   real: yr@Wr + yi@Wi      imag: yi@Wr - yr@Wi
    y_wr = jnp.dot(ys, wr, preferred_element_type=jnp.float32)
    y_wi = jnp.dot(ys, wi, preferred_element_type=jnp.float32)
    x0 = (y_wr + sgn * swap(y_wi)) * inv_p          # (2B, Ppad)
    b = x0 * inv_v                                  # data term Wt(y)/nvis

    # ---- depth loop: x = x - x@G + b, then global-max soft-threshold -------
    def body(_, x):
        xb = x.astype(jnp.bfloat16)                 # bf16 MXU operands
        x_gr = jnp.dot(xb, gr, preferred_element_type=jnp.float32)
        x_gi = jnp.dot(xb, gi, preferred_element_type=jnp.float32)
        #   complex x@G:  real: xr@Gr - xi@Gi   imag: xi@Gr + xr@Gi
        x = x - (x_gr - sgn * swap(x_gi)) + b

        # Shrinkage in squared magnitudes (single EUP rsqrt):
        #   scale = relu(1 - alpha*max|x| / |x|)   (0 where |x| == 0)
        sq = x * x
        msq = sq + swap(sq)                         # |x|^2 in both row blocks
        gmax = jnp.sqrt(jnp.max(msq))               # global max incl. batch
        t = (alpha * gmax) * lax.rsqrt(msq)
        scale = jnp.where(msq > 0.0, jnp.maximum(1.0 - t, 0.0), 0.0)
        return x * scale                            # sgn(x) * soft-thresh(|x|)

    xk = lax.fori_loop(0, depth, body, x0, unroll=(depth <= 4))

    # Final |x| -- only the real row-block is stored (half the output bytes).
    xr = xk[:batch]
    xi = xk[batch:]
    out_ref[...] = jnp.sqrt(xr * xr + xi * xi)


def unrolled_forward(y_real, y_imag, w_real, w_imag, alpha, depth):
    B, V = y_real.shape
    Vw, P = w_real.shape
    assert Vw == V

    # Lane-dense padding: pixel axis and visibility axis to multiples of 128,
    # batch so that 2*Bpad is a multiple of 8 (f32 sublane tile).
    p_pad = ((P + 127) // 128) * 128
    v_pad = ((V + 127) // 128) * 128
    b_pad = ((B + 3) // 4) * 4

    wr = jnp.pad(w_real.astype(jnp.float32), ((0, v_pad - V), (0, p_pad - P)))
    wi = jnp.pad(w_imag.astype(jnp.float32), ((0, v_pad - V), (0, p_pad - P)))
    yr = jnp.pad(y_real.astype(jnp.float32), ((0, b_pad - B), (0, v_pad - V)))
    yi = jnp.pad(y_imag.astype(jnp.float32), ((0, b_pad - B), (0, v_pad - V)))
    ys = jnp.concatenate([yr, yi], axis=0)          # (2*b_pad, v_pad)

    # Gram hoist (parameter-only, one-time, XLA side):
    #   G = W^T @ conj(W) / (npix2 * nvis)
    #   Gr = (Wr^T Wr + Wi^T Wi)/(P*V),  Gi = (Wi^T Wr - Wr^T Wi)/(P*V)
    g_scale = 1.0 / (float(P) * float(V))
    gr = ((wr.T @ wr + wi.T @ wi) * g_scale).astype(jnp.bfloat16)
    gi = ((wi.T @ wr - wr.T @ wi) * g_scale).astype(jnp.bfloat16)

    alpha_arr = jnp.asarray([alpha], dtype=jnp.float32)

    vmem = pl.BlockSpec(memory_space=pltpu.MemorySpace.VMEM)
    smem = pl.BlockSpec(memory_space=pltpu.MemorySpace.SMEM)

    out = pl.pallas_call(
        functools.partial(unrolled_kernel, depth=depth, batch=b_pad,
                          nvis=V, npix2=P),
        out_shape=jax.ShapeDtypeStruct((b_pad, p_pad), jnp.float32),
        in_specs=[smem, vmem, vmem, vmem, vmem, vmem],
        out_specs=vmem,
    )(alpha_arr, ys, wr, wi, gr, gi)
    return out[:B, :P]


# ---------------------------------------------------------------------------
# Pure-JAX reference (complex64) for correctness checking.
# ---------------------------------------------------------------------------
def reference_forward(y, W, alpha, depth):
    V, P = W.shape
    Wt = lambda a: a @ (jnp.conj(W) / P)
    x = Wt(y)
    for _ in range(depth):
        z = x @ W.T
        x = x - Wt(z) / V + Wt(y) / V
        mag = jnp.abs(x)
        gmax = jnp.max(mag)
        thr = jnp.maximum(mag - alpha * gmax, 0.0)
        sgn = jnp.where(mag > 0.0, x / jnp.where(mag > 0.0, mag, 1.0), 0.0)
        x = sgn * thr
    return jnp.abs(x)


if __name__ == "__main__":
    # Small synthetic problem consistent with the module's __init__.
    depth = 3
    npixel = 8                      # npix2 = 64
    nvis = 128
    batch = 8
    alpha = 0.1

    # Deterministic uvw / freq -> measurement operator H (nvis, npix2).
    key = jax.random.PRNGKey(0)
    k_uvw, k_yr, k_yi = jax.random.split(key, 3)
    uvw = np.asarray(
        jax.random.uniform(k_uvw, (nvis, 3), minval=-100.0, maxval=100.0),
        dtype=np.float64)
    freq = np.array([1.0e8, 1.5e8])
    H = forward_operator(uvw, freq, npixel)          # complex (nvis, npix2)

    w_real = jnp.asarray(H.real, dtype=jnp.float32)  # (nvis, npix2)
    w_imag = jnp.asarray(H.imag, dtype=jnp.float32)

    # Input visibilities y : complex (batch, nvis).
    y_real = jax.random.normal(k_yr, (batch, nvis), dtype=jnp.float32)
    y_imag = jax.random.normal(k_yi, (batch, nvis), dtype=jnp.float32)

    out = unrolled_forward(y_real, y_imag, w_real, w_imag, alpha, depth)
    out = jax.block_until_ready(out)

    # Correctness check against a complex64 pure-JAX reference.
    y_c = (y_real + 1j * y_imag).astype(jnp.complex64)
    W_c = (w_real + 1j * w_imag).astype(jnp.complex64)
    ref = jax.block_until_ready(reference_forward(y_c, W_c, alpha, depth))
    np.testing.assert_allclose(np.asarray(out), np.asarray(ref),
                               rtol=2e-2, atol=5e-3)

    print("KERNEL_OK")
</pallas_src>

<mosaic_0001>
module attributes {stable_mosaic.version = 11 : i64} {
  func.func @unrolled_kernel(%arg0: memref<1xf32, #tpu.memory_space<smem>>, %arg1: memref<16x128xf32, #tpu.memory_space<vmem>>, %arg2: memref<128x128xf32, #tpu.memory_space<vmem>>, %arg3: memref<128x128xf32, #tpu.memory_space<vmem>>, %arg4: memref<128x128xbf16, #tpu.memory_space<vmem>>, %arg5: memref<128x128xbf16, #tpu.memory_space<vmem>>, %arg6: memref<8x128xf32, #tpu.memory_space<vmem>>) attributes {dimension_semantics = [], scalar_prefetch = 0 : i64, scratch_operands = 0 : i64, tpu.core_type = #tpu.core_type<tc>} {
    %c0 = arith.constant 0 : index
    %c0_0 = arith.constant 0 : index
    %0 = vector.load %arg1[%c0, %c0_0] : memref<16x128xf32, #tpu.memory_space<vmem>>, vector<16x128xf32>
    %c0_1 = arith.constant 0 : index
    %c0_2 = arith.constant 0 : index
    %1 = vector.load %arg2[%c0_1, %c0_2] : memref<128x128xf32, #tpu.memory_space<vmem>>, vector<128x128xf32>
    %c0_3 = arith.constant 0 : index
    %c0_4 = arith.constant 0 : index
    %2 = vector.load %arg3[%c0_3, %c0_4] : memref<128x128xf32, #tpu.memory_space<vmem>>, vector<128x128xf32>
    %c0_5 = arith.constant 0 : index
    %c0_6 = arith.constant 0 : index
    %3 = vector.load %arg4[%c0_5, %c0_6] : memref<128x128xbf16, #tpu.memory_space<vmem>>, vector<128x128xbf16>
    %c0_7 = arith.constant 0 : index
    %c0_8 = arith.constant 0 : index
    %4 = vector.load %arg5[%c0_7, %c0_8] : memref<128x128xbf16, #tpu.memory_space<vmem>>, vector<128x128xbf16>
    %c0_9 = arith.constant 0 : index
    %5 = memref.load %arg0[%c0_9] : memref<1xf32, #tpu.memory_space<smem>>
    %6 = tpu.iota {dimensions = array<i32: 0>} : vector<16x1xi32>
    %c8_i32 = arith.constant 8 : i32
    %7 = vector.broadcast %c8_i32 : i32 to vector<16x1xi32>
    %8 = arith.cmpi slt, %6, %7 : vector<16x1xi32>
    %cst = arith.constant 1.000000e+00 : f32
    %cst_10 = arith.constant -1.000000e+00 : f32
    %9 = vector.broadcast %cst : f32 to vector<16x1xf32>
    %10 = vector.broadcast %cst_10 : f32 to vector<16x1xf32>
    %11 = arith.select %8, %9, %10 : vector<16x1xi1>, vector<16x1xf32>
    %12 = vector.shape_cast %11 : vector<16x1xf32> to vector<16x1xf32>
    %13 = vector.broadcast %12 : vector<16x1xf32> to vector<16x128xf32>
    %cst_11 = arith.constant dense<0.000000e+00> : vector<16x128xf32>
    %14 = tpu.matmul %0, %1, %cst_11 {dimension_numbers = #tpu.dot_dimension_numbers<[1], [0], [0], [1], [0, 0, 1, 1], [], []>} : vector<16x128xf32>, vector<128x128xf32>, vector<16x128xf32> -> vector<16x128xf32>
    %cst_12 = arith.constant dense<0.000000e+00> : vector<16x128xf32>
    %15 = tpu.matmul %0, %2, %cst_12 {dimension_numbers = #tpu.dot_dimension_numbers<[1], [0], [0], [1], [0, 0, 1, 1], [], []>} : vector<16x128xf32>, vector<128x128xf32>, vector<16x128xf32> -> vector<16x128xf32>
    %c8_i32_13 = arith.constant 8 : i32
    %16 = tpu.dynamic_rotate %15 by %c8_i32_13 dim 0 : vector<16x128xf32>, i32 -> vector<16x128xf32>
    %17 = arith.mulf %13, %16 : vector<16x128xf32>
    %18 = arith.addf %14, %17 : vector<16x128xf32>
    %cst_14 = arith.constant 1.562500e-02 : f32
    %19 = vector.broadcast %cst_14 : f32 to vector<16x128xf32>
    %20 = arith.mulf %18, %19 : vector<16x128xf32>
    %cst_15 = arith.constant 7.812500e-03 : f32
    %21 = vector.broadcast %cst_15 : f32 to vector<16x128xf32>
    %22 = arith.mulf %20, %21 : vector<16x128xf32>
    %c0_i32 = arith.constant 0 : i32
    %23 = arith.truncf %20 : vector<16x128xf32> to vector<16x128xbf16>
    %cst_16 = arith.constant dense<0.000000e+00> : vector<16x128xf32>
    %24 = tpu.matmul %23, %3, %cst_16 {dimension_numbers = #tpu.dot_dimension_numbers<[1], [0], [0], [1], [0, 0, 1, 1], [], []>} : vector<16x128xbf16>, vector<128x128xbf16>, vector<16x128xf32> -> vector<16x128xf32>
    %cst_17 = arith.constant dense<0.000000e+00> : vector<16x128xf32>
    %25 = tpu.matmul %23, %4, %cst_17 {dimension_numbers = #tpu.dot_dimension_numbers<[1], [0], [0], [1], [0, 0, 1, 1], [], []>} : vector<16x128xbf16>, vector<128x128xbf16>, vector<16x128xf32> -> vector<16x128xf32>
    %c8_i32_18 = arith.constant 8 : i32
    %26 = tpu.dynamic_rotate %25 by %c8_i32_18 dim 0 : vector<16x128xf32>, i32 -> vector<16x128xf32>
    %27 = arith.mulf %13, %26 : vector<16x128xf32>
    %28 = arith.subf %24, %27 : vector<16x128xf32>
    %29 = arith.subf %20, %28 : vector<16x128xf32>
    %30 = arith.addf %29, %22 : vector<16x128xf32>
    %31 = arith.mulf %30, %30 : vector<16x128xf32>
    %c8_i32_19 = arith.constant 8 : i32
    %32 = tpu.dynamic_rotate %31 by %c8_i32_19 dim 0 : vector<16x128xf32>, i32 -> vector<16x128xf32>
    %33 = arith.addf %31, %32 : vector<16x128xf32>
    %34 = vector.shape_cast %33 : vector<16x128xf32> to vector<1x16x128xf32>
    %cst_20 = arith.constant dense<0xFF800000> : vector<1xf32>
    %35 = vector.multi_reduction <maximumf>, %34, %cst_20 [1, 2] : vector<1x16x128xf32> to vector<1xf32>
    %36 = vector.shape_cast %35 : vector<1xf32> to vector<1x1x1xf32>
    %37 = vector.extract %36[0, 0, 0] : f32 from vector<1x1x1xf32>
    %38 = math.sqrt %37 : f32
    %39 = arith.mulf %5, %38 : f32
    %40 = math.rsqrt %33 : vector<16x128xf32>
    %41 = vector.broadcast %39 : f32 to vector<16x128xf32>
    %42 = arith.mulf %41, %40 : vector<16x128xf32>
    %cst_21 = arith.constant 0.000000e+00 : f32
    %43 = vector.broadcast %cst_21 : f32 to vector<16x128xf32>
    %44 = arith.cmpf ogt, %33, %43 : vector<16x128xf32>
    %cst_22 = arith.constant 1.000000e+00 : f32
    %45 = vector.broadcast %cst_22 : f32 to vector<16x128xf32>
    %46 = arith.subf %45, %42 : vector<16x128xf32>
    %cst_23 = arith.constant 0.000000e+00 : f32
    %47 = vector.broadcast %cst_23 : f32 to vector<16x128xf32>
    %48 = arith.maximumf %46, %47 : vector<16x128xf32>
    %cst_24 = arith.constant 0.000000e+00 : f32
    %49 = vector.broadcast %cst_24 : f32 to vector<16x128xf32>
    %50 = arith.select %44, %48, %49 : vector<16x128xi1>, vector<16x128xf32>
    %51 = arith.mulf %30, %50 : vector<16x128xf32>
    %c1_i32 = arith.constant 1 : i32
    %52 = arith.truncf %51 : vector<16x128xf32> to vector<16x128xbf16>
    %cst_25 = arith.constant dense<0.000000e+00> : vector<16x128xf32>
    %53 = tpu.matmul %52, %3, %cst_25 {dimension_numbers = #tpu.dot_dimension_numbers<[1], [0], [0], [1], [0, 0, 1, 1], [], []>} : vector<16x128xbf16>, vector<128x128xbf16>, vector<16x128xf32> -> vector<16x128xf32>
    %cst_26 = arith.constant dense<0.000000e+00> : vector<16x128xf32>
    %54 = tpu.matmul %52, %4, %cst_26 {dimension_numbers = #tpu.dot_dimension_numbers<[1], [0], [0], [1], [0, 0, 1, 1], [], []>} : vector<16x128xbf16>, vector<128x128xbf16>, vector<16x128xf32> -> vector<16x128xf32>
    %c8_i32_27 = arith.constant 8 : i32
    %55 = tpu.dynamic_rotate %54 by %c8_i32_27 dim 0 : vector<16x128xf32>, i32 -> vector<16x128xf32>
    %56 = arith.mulf %13, %55 : vector<16x128xf32>
    %57 = arith.subf %53, %56 : vector<16x128xf32>
    %58 = arith.subf %51, %57 : vector<16x128xf32>
    %59 = arith.addf %58, %22 : vector<16x128xf32>
    %60 = arith.mulf %59, %59 : vector<16x128xf32>
    %c8_i32_28 = arith.constant 8 : i32
    %61 = tpu.dynamic_rotate %60 by %c8_i32_28 dim 0 : vector<16x128xf32>, i32 -> vector<16x128xf32>
    %62 = arith.addf %60, %61 : vector<16x128xf32>
    %63 = vector.shape_cast %62 : vector<16x128xf32> to vector<1x16x128xf32>
    %cst_29 = arith.constant dense<0xFF800000> : vector<1xf32>
    %64 = vector.multi_reduction <maximumf>, %63, %cst_29 [1, 2] : vector<1x16x128xf32> to vector<1xf32>
    %65 = vector.shape_cast %64 : vector<1xf32> to vector<1x1x1xf32>
    %66 = vector.extract %65[0, 0, 0] : f32 from vector<1x1x1xf32>
    %67 = math.sqrt %66 : f32
    %68 = arith.mulf %5, %67 : f32
    %69 = math.rsqrt %62 : vector<16x128xf32>
    %70 = vector.broadcast %68 : f32 to vector<16x128xf32>
    %71 = arith.mulf %70, %69 : vector<16x128xf32>
    %cst_30 = arith.constant 0.000000e+00 : f32
    %72 = vector.broadcast %cst_30 : f32 to vector<16x128xf32>
    %73 = arith.cmpf ogt, %62, %72 : vector<16x128xf32>
    %cst_31 = arith.constant 1.000000e+00 : f32
    %74 = vector.broadcast %cst_31 : f32 to vector<16x128xf32>
    %75 = arith.subf %74, %71 : vector<16x128xf32>
    %cst_32 = arith.constant 0.000000e+00 : f32
    %76 = vector.broadcast %cst_32 : f32 to vector<16x128xf32>
    %77 = arith.maximumf %75, %76 : vector<16x128xf32>
    %cst_33 = arith.constant 0.000000e+00 : f32
    %78 = vector.broadcast %cst_33 : f32 to vector<16x128xf32>
    %79 = arith.select %73, %77, %78 : vector<16x128xi1>, vector<16x128xf32>
    %80 = arith.mulf %59, %79 : vector<16x128xf32>
    %c2_i32 = arith.constant 2 : i32
    %81 = arith.truncf %80 : vector<16x128xf32> to vector<16x128xbf16>
    %cst_34 = arith.constant dense<0.000000e+00> : vector<16x128xf32>
    %82 = tpu.matmul %81, %3, %cst_34 {dimension_numbers = #tpu.dot_dimension_numbers<[1], [0], [0], [1], [0, 0, 1, 1], [], []>} : vector<16x128xbf16>, vector<128x128xbf16>, vector<16x128xf32> -> vector<16x128xf32>
    %cst_35 = arith.constant dense<0.000000e+00> : vector<16x128xf32>
    %83 = tpu.matmul %81, %4, %cst_35 {dimension_numbers = #tpu.dot_dimension_numbers<[1], [0], [0], [1], [0, 0, 1, 1], [], []>} : vector<16x128xbf16>, vector<128x128xbf16>, vector<16x128xf32> -> vector<16x128xf32>
    %c8_i32_36 = arith.constant 8 : i32
    %84 = tpu.dynamic_rotate %83 by %c8_i32_36 dim 0 : vector<16x128xf32>, i32 -> vector<16x128xf32>
    %85 = arith.mulf %13, %84 : vector<16x128xf32>
    %86 = arith.subf %82, %85 : vector<16x128xf32>
    %87 = arith.subf %80, %86 : vector<16x128xf32>
    %88 = arith.addf %87, %22 : vector<16x128xf32>
    %89 = arith.mulf %88, %88 : vector<16x128xf32>
    %c8_i32_37 = arith.constant 8 : i32
    %90 = tpu.dynamic_rotate %89 by %c8_i32_37 dim 0 : vector<16x128xf32>, i32 -> vector<16x128xf32>
    %91 = arith.addf %89, %90 : vector<16x128xf32>
    %92 = vector.shape_cast %91 : vector<16x128xf32> to vector<1x16x128xf32>
    %cst_38 = arith.constant dense<0xFF800000> : vector<1xf32>
    %93 = vector.multi_reduction <maximumf>, %92, %cst_38 [1, 2] : vector<1x16x128xf32> to vector<1xf32>
    %94 = vector.shape_cast %93 : vector<1xf32> to vector<1x1x1xf32>
    %95 = vector.extract %94[0, 0, 0] : f32 from vector<1x1x1xf32>
    %96 = math.sqrt %95 : f32
    %97 = arith.mulf %5, %96 : f32
    %98 = math.rsqrt %91 : vector<16x128xf32>
    %99 = vector.broadcast %97 : f32 to vector<16x128xf32>
    %100 = arith.mulf %99, %98 : vector<16x128xf32>
    %cst_39 = arith.constant 0.000000e+00 : f32
    %101 = vector.broadcast %cst_39 : f32 to vector<16x128xf32>
    %102 = arith.cmpf ogt, %91, %101 : vector<16x128xf32>
    %cst_40 = arith.constant 1.000000e+00 : f32
    %103 = vector.broadcast %cst_40 : f32 to vector<16x128xf32>
    %104 = arith.subf %103, %100 : vector<16x128xf32>
    %cst_41 = arith.constant 0.000000e+00 : f32
    %105 = vector.broadcast %cst_41 : f32 to vector<16x128xf32>
    %106 = arith.maximumf %104, %105 : vector<16x128xf32>
    %cst_42 = arith.constant 0.000000e+00 : f32
    %107 = vector.broadcast %cst_42 : f32 to vector<16x128xf32>
    %108 = arith.select %102, %106, %107 : vector<16x128xi1>, vector<16x128xf32>
    %109 = arith.mulf %88, %108 : vector<16x128xf32>
    %110 = vector.extract_strided_slice %109 {offsets = [0, 0], sizes = [8, 128], strides = [1, 1]} : vector<16x128xf32> to vector<8x128xf32>
    %111 = vector.extract_strided_slice %109 {offsets = [8, 0], sizes = [8, 128], strides = [1, 1]} : vector<16x128xf32> to vector<8x128xf32>
    %112 = arith.mulf %110, %110 : vector<8x128xf32>
    %113 = arith.mulf %111, %111 : vector<8x128xf32>
    %114 = arith.addf %112, %113 : vector<8x128xf32>
    %115 = math.sqrt %114 : vector<8x128xf32>
    %c0_43 = arith.constant 0 : index
    %c0_44 = arith.constant 0 : index
    %116 = vector.load %arg6[%c0_43, %c0_44] : memref<8x128xf32, #tpu.memory_space<vmem>>, vector<8x128xf32>
    tpu.vector_store %arg6[%c0_43, %c0_44], %115 {strides = array<i32>} : memref<8x128xf32, #tpu.memory_space<vmem>>, vector<8x128xf32>,
    return
  }
}

</mosaic_0001>

<bundles_post_ra>
// kernel: tpu_custom_call.1
= control target key start
LH: loop header
LB: loop body
LE: loop exit
PB: predicated region body
PF: predicated region fallthrough
CT: control target
= control target key end

     0   :  { %12 = vsyncpa [#allocation4], 0  ;;  %s996_s0 = inlined_call_operand.<no memory space> [shape: f32[1], index: 0, kind: input, shape index: {}]   ;;  %s997_s1 = inlined_call_operand.hbm [shape: f32[16,128], index: 1, kind: input, shape index: {}]   ;;  %s998_s2 = inlined_call_operand.hbm [shape: f32[128,128], index: 2, kind: input, shape index: {}]   ;;  %s999_s3 = inlined_call_operand.hbm [shape: f32[128,128], index: 3, kind: input, shape index: {}]   ;;  %s1000_s4 = inlined_call_operand.hbm [shape: bf16[128,128], index: 4, kind: input, shape index: {}]   ;;  %s1001_s5 = inlined_call_operand.hbm [shape: bf16[128,128], index: 5, kind: input, shape index: {}]   ;;  %s1002_s6 = inlined_call_operand.hbm [shape: f32[8,128], index: 6, kind: output, shape index: {}]  }
   0x1   :  { %13 = vsyncpa [#allocation7], 0 }
   0x2   :  { %14 = vsyncpa [#allocation10], 0 }
   0x3   :  { %15 = vsyncpa [#allocation5], 0  ;;  %s35_s23 = sshll.u32 %s998_s2, 4  ;;  %s874_s24 = smov [#allocation6]   ;;  %s36_s23 = int_to_ptr.hbm [resolvable:$true] %s35_s23 }
   0x4   :  { %s37_s25 = sshll.u32 %s874_s24, 4  ;;  %s61_s28 = sshll.u32 %s1000_s4, 4  ;;  %s38_s25 = int_to_ptr.vmem [resolvable:$true] %s37_s25  ;;  %s62_s28 = int_to_ptr.hbm [resolvable:$true] %s61_s28 }
   0x5   :  { %s875_s29 = smov 128   ;;  %s876_s30 = smov 8  }
   0x6   :  { %43 = dma.hbm_to_vmem [thread:$0]  %s36_s23, 2048, %s38_s25, [#allocation7], %s875_s29, %s875_s29, %s876_s30  }
   0x7   :  { %s877_s7 = smov [#allocation9]   ;;  %s878_s9 = smov 64  }
   0x8   :  { %s63_s8 = sshll.u32 %s877_s7, 4  ;;  %s879_s10 = smov 4   ;;  %s64_s8 = int_to_ptr.vmem [resolvable:$true] %s63_s8 }
   0x9   :  { %69 = dma.hbm_to_vmem [thread:$0]  %s62_s28, 1024, %s64_s8, [#allocation10], %s878_s9, %s878_s9, %s879_s10  }
   0xa   :  { %s22_s12 = sshll.u32 %s997_s1, 4  ;;  %s880_s13 = smov [#allocation3]   ;;  %s23_s12 = int_to_ptr.hbm [resolvable:$true] %s22_s12 }
   0xb   :  { %s24_s14 = sshll.u32 %s880_s13, 4  ;;  %s48_s16 = sshll.u32 %s999_s3, 4  ;;  %s25_s14 = int_to_ptr.vmem [resolvable:$true] %s24_s14  ;;  %s49_s16 = int_to_ptr.hbm [resolvable:$true] %s48_s16 }
   0xc   :  { %30 = dma.hbm_to_vmem [thread:$0]  %s23_s12, 256, %s25_s14, [#allocation4], %s875_s29, %s875_s29, %s876_s30  }
   0xd   :  { %s881_s17 = smov [#allocation8]   ;;  %s74_s21 = sshll.u32 %s1001_s5, 4  ;;  %s75_s21 = int_to_ptr.hbm [resolvable:$true] %s74_s21 }
   0xe   :  { %s50_s18 = sshll.u32 %s881_s17, 4  ;;  %s882_s1 = smov [#allocation11]   ;;  %s51_s18 = int_to_ptr.vmem [resolvable:$true] %s50_s18 }
   0xf   :  { %56 = dma.hbm_to_vmem [thread:$0]  %s49_s16, 2048, %s51_s18, [#allocation7], %s875_s29, %s875_s29, %s876_s30  }
  0x10   :  { %s76_s22 = sshll.u32 %s882_s1, 4  ;;  %s77_s22 = int_to_ptr.vmem [resolvable:$true] %s76_s22 }
  0x11   :  { %82 = dma.hbm_to_vmem [thread:$0]  %s75_s21, 1024, %s77_s22, [#allocation10], %s878_s9, %s878_s9, %s879_s10  }
  0x12   :  { %866 = dma.done.wait [#allocation4], 256  }
  0x13   :  { %867 = vsyncadd [#allocation4], 4294967040 }
  0x14   :  { %868 = dma.done.wait [#allocation7], 4096  }
  0x15   :  { %869 = vsyncadd [#allocation7], 4294963200 }
  0x16   :  { %870 = dma.done.wait [#allocation10], 2048  }
  0x17   :  { %871 = vsyncadd [#allocation10], 4294965248  ;;  %v136_v0 = vld [vmem:[#allocation8 + $0x78] sm:$0xff]  ;;  %v135_v2 = vld [vmem:[#allocation8 + $0x70] sm:$0xff]  ;;  %s594_s14 = sshll.u32 %s1002_s6, 4  ;;  %s595_s14 = int_to_ptr.hbm [resolvable:$true] %s594_s14 }
  0x18   :  { %v120_v1 = vld [vmem:[#allocation6 + $0x78] sm:$0xff]  ;;  %177 = vmatpush.msra.mxu0 %v136_v0  ;;  %v119_v3 = vld [vmem:[#allocation6 + $0x70] sm:$0xff]  ;;  %v134_v4 = vld [vmem:[#allocation8 + $0x68] sm:$0xff] }
  0x19   :  { %202 = vmatpush.msra.mxu1 %v120_v1  ;;  %v118_v5 = vld [vmem:[#allocation6 + $0x68] sm:$0xff]  ;;  %v133_v6 = vld [vmem:[#allocation8 + $0x60] sm:$0xff]  ;;  %v132_v8 = vld [vmem:[#allocation8 + $0x58] sm:$0xff] }
  0x1a   :  { %178 = vmatpush.msra.mxu0 %v135_v2  ;;  %v117_v7 = vld [vmem:[#allocation6 + $0x60] sm:$0xff]  ;;  %v116_v9 = vld [vmem:[#allocation6 + $0x58] sm:$0xff]  ;;  %v131_v10 = vld [vmem:[#allocation8 + $0x50] sm:$0xff] }
  0x1b   :  { %203 = vmatpush.msra.mxu1 %v119_v3  ;;  %v115_v11 = vld [vmem:[#allocation6 + $0x50] sm:$0xff]  ;;  %v130_v12 = vld [vmem:[#allocation8 + $0x48] sm:$0xff]  ;;  %v934_v14 = vld [vmem:[#allocation9 + $0x38] sm:$0xff] }
  0x1c   :  { %179 = vmatpush.msra.mxu0 %v134_v4  ;;  %v114_v13 = vld [vmem:[#allocation6 + $0x48] sm:$0xff]  ;;  %v936_v15 = vld [vmem:[#allocation11 + $0x38] sm:$0xff]  ;;  %v129_v16 = vld [vmem:[#allocation8 + $0x40] sm:$0xff]  ;;  %278 = vmatpush.bf16.msra.mxu2 %v934_v14 }
  0x1d   :  { %204 = vmatpush.msra.mxu1 %v118_v5  ;;  %v113_v17 = vld [vmem:[#allocation6 + $0x40] sm:$0xff]  ;;  %v128_v18 = vld [vmem:[#allocation8 + $0x38] sm:$0xff]  ;;  %340 = vmatpush.bf16.msra.mxu3 %v936_v15  ;;  %v940_v20 = vld [vmem:[#allocation9 + $0x30] sm:$0xff] }
  0x1e   :  { %180 = vmatpush.msra.mxu0 %v133_v6  ;;  %v112_v19 = vld [vmem:[#allocation6 + $0x38] sm:$0xff]  ;;  %v942_v21 = vld [vmem:[#allocation11 + $0x30] sm:$0xff]  ;;  %v126_v24 = vld [vmem:[#allocation8 + $0x28] sm:$0xff] }
  0x1f   :  { %205 = vmatpush.msra.mxu1 %v117_v7  ;;  %v127_v22 = vld [vmem:[#allocation8 + $0x30] sm:$0xff]  ;;  %v110_v25 = vld [vmem:[#allocation6 + $0x28] sm:$0xff]  ;;  %v125_v28 = vld [vmem:[#allocation8 + $0x20] sm:$0xff] }
  0x20   :  { %181 = vmatpush.msra.mxu0 %v132_v8  ;;  %v111_v23 = vld [vmem:[#allocation6 + $0x30] sm:$0xff]  ;;  %279 = vmatpush.bf16.msra.mxu2 %v940_v20  ;;  %v946_v26 = vld [vmem:[#allocation9 + $0x28] sm:$0xff]  ;;  %v109_v29 = vld [vmem:[#allocation6 + $0x20] sm:$0xff] }
  0x21   :  { %206 = vmatpush.msra.mxu1 %v116_v9  ;;  %341 = vmatpush.bf16.msra.mxu3 %v942_v21  ;;  %v948_v27 = vld [vmem:[#allocation11 + $0x28] sm:$0xff]  ;;  %v124_v30 = vld [vmem:[#allocation8 + $0x18] sm:$0xff]  ;;  %v952_v32 = vld [vmem:[#allocation9 + $0x20] sm:$0xff] }
  0x22   :  { %182 = vmatpush.msra.mxu0 %v131_v10  ;;  %v108_v31 = vld [vmem:[#allocation6 + $0x18] sm:$0xff]  ;;  %v954_v33 = vld [vmem:[#allocation11 + $0x20] sm:$0xff]  ;;  %v123_v34 = vld [vmem:[#allocation8 + $0x10] sm:$0xff] }
  0x23   :  { %207 = vmatpush.msra.mxu1 %v115_v11  ;;  %v107_v35 = vld [vmem:[#allocation6 + $0x10] sm:$0xff]  ;;  %v122_v36 = vld [vmem:[#allocation8 + $0x8] sm:$0xff]  ;;  %v121_v38 = vld [vmem:[#allocation8] sm:$0xff] }
  0x24   :  { %183 = vmatpush.msra.mxu0 %v130_v12  ;;  %280 = vmatpush.bf16.msra.mxu2 %v946_v26  ;;  %v106_v37 = vld [vmem:[#allocation6 + $0x8] sm:$0xff]  ;;  %v105_v39 = vld [vmem:[#allocation6] sm:$0xff]  ;;  %v103_v40 = vld [vmem:[#allocation3] sm:$0xff] }
  0x25   :  { %208 = vmatpush.msra.mxu1 %v114_v13  ;;  %342 = vmatpush.bf16.msra.mxu3 %v948_v27  ;;  %v104_v41 = vld [vmem:[#allocation3 + $0x8] sm:$0xff]  ;;  %v672_v44 = vld [vmem:[#allocation9 + $0x10] sm:$0xff]  ;;  %v671_v46 = vld [vmem:[#allocation9 + $0x8] sm:$0xff] }
  0x26   :  { %184 = vmatpush.msra.mxu0 %v129_v16  ;;  %v673_v42 = vld [vmem:[#allocation9 + $0x18] sm:$0xff]  ;;  %v680_v45 = vld [vmem:[#allocation11 + $0x10] sm:$0xff]  ;;  %v679_v47 = vld [vmem:[#allocation11 + $0x8] sm:$0xff] }
  0x27   :  { %209 = vmatpush.msra.mxu1 %v113_v17  ;;  %v681_v43 = vld [vmem:[#allocation11 + $0x18] sm:$0xff]  ;;  %v670_v48 = vld [vmem:[#allocation9] sm:$0xff] }
  0x28   :  { %185 = vmatpush.msra.mxu0 %v128_v18  ;;  %281 = vmatpush.bf16.msra.mxu2 %v952_v32  ;;  %v678_v49 = vld [vmem:[#allocation11] sm:$0xff] }
  0x29   :  { %210 = vmatpush.msra.mxu1 %v112_v19  ;;  %343 = vmatpush.bf16.msra.mxu3 %v954_v33 }
  0x2a   :  { %186 = vmatpush.msra.mxu0 %v127_v22 }
  0x2b   :  { %211 = vmatpush.msra.mxu1 %v111_v23 }
  0x2c   :  { %187 = vmatpush.msra.mxu0 %v126_v24  ;;  %282 = vmatpush.bf16.msra.mxu2 %v673_v42 }
  0x2d   :  { %212 = vmatpush.msra.mxu1 %v110_v25  ;;  %344 = vmatpush.bf16.msra.mxu3 %v681_v43 }
  0x2e   :  { %188 = vmatpush.msra.mxu0 %v125_v28 }
  0x2f   :  { %213 = vmatpush.msra.mxu1 %v109_v29 }
  0x30   :  { %189 = vmatpush.msra.mxu0 %v124_v30  ;;  %283 = vmatpush.bf16.msra.mxu2 %v672_v44 }
  0x31   :  { %214 = vmatpush.msra.mxu1 %v108_v31  ;;  %345 = vmatpush.bf16.msra.mxu3 %v680_v45 }
  0x32   :  { %190 = vmatpush.msra.mxu0 %v123_v34 }
  0x33   :  { %215 = vmatpush.msra.mxu1 %v107_v35 }
  0x34   :  { %191 = vmatpush.msra.mxu0 %v122_v36  ;;  %284 = vmatpush.bf16.msra.mxu2 %v671_v46 }
  0x35   :  { %216 = vmatpush.msra.mxu1 %v106_v37  ;;  %346 = vmatpush.bf16.msra.mxu3 %v679_v47 }
  0x36   :  { %192 = vmatpush.msra.mxu0 %v121_v38 }
  0x37   :  { %217 = vmatpush.msra.mxu1 %v105_v39  ;;  %193 = vmatmul.f32.vlgmr.msra.gmra.mxu0 %v103_v40 }
  0x38   :  { %218 = vmatmul.f32.vlgmr.msra.gmra.mxu1 %v103_v40  ;;  %408 = vmatpush.bf16.msrb.mxu0 %v934_v14 }
  0x39   :  { %422 = vmatpush.bf16.msrb.mxu1 %v936_v15  ;;  %285 = vmatpush.bf16.msra.mxu2 %v670_v48 }
  0x3a   :  { %347 = vmatpush.bf16.msra.mxu3 %v678_v49 }
  0x3c   :  { %409 = vmatpush.bf16.msrb.mxu0 %v940_v20 }
  0x3d   :  { %423 = vmatpush.bf16.msrb.mxu1 %v942_v21  ;;  %490 = vmatpush.bf16.msrb.mxu2 %v934_v14 }
  0x3e   :  { %504 = vmatpush.bf16.msrb.mxu3 %v936_v15 }
  0x3f   :  { %196 = vmatmul.f32.gmra.mxu0 %v104_v41 }
  0x40   :  { %221 = vmatmul.f32.gmra.mxu1 %v104_v41  ;;  %410 = vmatpush.bf16.msrb.mxu0 %v946_v26 }
  0x41   :  { %424 = vmatpush.bf16.msrb.mxu1 %v948_v27  ;;  %491 = vmatpush.bf16.msrb.mxu2 %v940_v20 }
  0x42   :  { %505 = vmatpush.bf16.msrb.mxu3 %v942_v21 }
  0x44   :  { %411 = vmatpush.bf16.msrb.mxu0 %v952_v32 }
  0x45   :  { %425 = vmatpush.bf16.msrb.mxu1 %v954_v33  ;;  %492 = vmatpush.bf16.msrb.mxu2 %v946_v26 }
  0x46   :  { %506 = vmatpush.bf16.msrb.mxu3 %v948_v27 }
  0x48   :  { %412 = vmatpush.bf16.msrb.mxu0 %v673_v42 }
  0x49   :  { %426 = vmatpush.bf16.msrb.mxu1 %v681_v43  ;;  %493 = vmatpush.bf16.msrb.mxu2 %v952_v32 }
  0x4a   :  { %507 = vmatpush.bf16.msrb.mxu3 %v954_v33 }
  0x4c   :  { %413 = vmatpush.bf16.msrb.mxu0 %v672_v44 }
  0x4d   :  { %427 = vmatpush.bf16.msrb.mxu1 %v680_v45  ;;  %494 = vmatpush.bf16.msrb.mxu2 %v673_v42 }
  0x4e   :  { %508 = vmatpush.bf16.msrb.mxu3 %v681_v43 }
  0x50   :  { %414 = vmatpush.bf16.msrb.mxu0 %v671_v46 }
  0x51   :  { %428 = vmatpush.bf16.msrb.mxu1 %v679_v47  ;;  %495 = vmatpush.bf16.msrb.mxu2 %v672_v44 }
  0x52   :  { %509 = vmatpush.bf16.msrb.mxu3 %v680_v45 }
  0x54   :  { %415 = vmatpush.bf16.msrb.mxu0 %v670_v48 }
  0x55   :  { %429 = vmatpush.bf16.msrb.mxu1 %v678_v49  ;;  %496 = vmatpush.bf16.msrb.mxu2 %v671_v46 }
  0x56   :  { %510 = vmatpush.bf16.msrb.mxu3 %v679_v47 }
  0x59   :  { %497 = vmatpush.bf16.msrb.mxu2 %v670_v48 }
  0x5a   :  { %511 = vmatpush.bf16.msrb.mxu3 %v678_v49 }
  0xb4   :  { %v194_v50 = vpop.f32.mrf.mxu0 }
  0xb5   :  { %v219_v51 = vpop.f32.mrf.mxu1  ;;  %v201_v52 = vmul.f32 -1.0, %v194_v50 }
  0xbc   :  { %v197_v53 = vpop.f32.mrf.mxu0 }
  0xbd   :  { %v222_v54 = vpop.f32.mrf.mxu1  ;;  %v220_v55 = vadd.f32 %v219_v51, %v197_v53 }
  0xbe   :  { %v223_v56 = vadd.f32 %v222_v54, %v201_v52 }
  0xbf   :  { %v225_v57 = vmul.f32 0.015625, %v220_v55 }
  0xc0   :  { %v226_v58 = vmul.f32 0.015625, %v223_v56 }
  0xc1   :  { %v974_v3 = vmul.f32 0.0078125, %v225_v57 }
  0xc2   :  { %v229_v59 = vpack.c.bf16 %v226_v58, %v225_v57  ;;  %v976_v4 = vmul.f32 0.0078125, %v226_v58 }
  0xc4   :  { %286 = vmatmul.bf16.vlgmr.msra.gmra.mxu2 %v229_v59  ;;  %348 = vmatmul.bf16.vlgmr.msra.gmra.mxu3 %v229_v59 }
 0x147   :  { %v287_v60 = vpop.f32.mrf.mxu2  ;;  %v349_v61 = vpop.f32.mrf.mxu3 }
 0x148   :  { %v355_v62 = vmul.f32 -1.0, %v349_v61 }
 0x14f   :  { %v289_v63 = vpop.f32.mrf.mxu2  ;;  %v351_v0 = vpop.f32.mrf.mxu3 }
 0x150   :  { %v357_v1 = vsub.f32 %v289_v63, %v355_v62  ;;  %v356_v2 = vsub.f32 %v287_v60, %v351_v0 }
 0x152   :  { %v359_v5 = vsub.f32 %v226_v58, %v357_v1  ;;  %v358_v6 = vsub.f32 %v225_v57, %v356_v2 }
 0x154   :  { %v361_v7 = vadd.f32 %v359_v5, %v976_v4  ;;  %v360_v8 = vadd.f32 %v358_v6, %v974_v3 }
 0x156   :  { %v363_v9 = vmul.f32 %v361_v7, %v361_v7  ;;  %v362_v10 = vmul.f32 %v360_v8, %v360_v8 }
 0x158   :  { %v364_v11 = vadd.f32 %v363_v9, %v362_v10 }
 0x15a   :  { %365 = vmax.xlane.f32.xlu0 %v364_v11  ;;  %vm395_vm3 = vweird.f32 %v364_v11  ;;  %vm401_vm5 = vcmp.gt.f32.partialorder %v364_v11, 0.0 }
 0x1cd   :  { %v366_v12 = vpop.xlane.xlu0 %365 }
 0x1ce   :  { %v367_v13 = vrot.slane %v366_v12, 4 }
 0x1d0   :  { %v368_v14 = vmax.f32 %v366_v12, %v367_v13 }
 0x1d2   :  { %v369_v15 = vrot.slane %v368_v14, 2 }
 0x1d4   :  { %v370_v16 = vmax.f32 %v368_v14, %v369_v15 }
 0x1d6   :  { %v371_v17 = vrot.slane %v370_v16, 1 }
 0x1d8   :  { %v372_v18 = vmax.f32 %v370_v16, %v371_v17 }
 0x1da   :  { %686 = vpush %v372_v18 }
 0x20b   :  { %s687_s3 = spop %686 }
 0x20c   :  { %v374_v19 = vstv %s687_s3 }
 0x20d   :  { %708 = vrsqrt.f32 %v374_v19  ;;  %vm382_vm0 = vcmp.eq.f32.partialorder %v374_v19, inf  ;;  %v385_v27 = vand.u32 2147483648, %v374_v19  ;;  %vm384_vm1 = vcmp.eq.f32.partialorder %v374_v19, 0.0 }
 0x20e   :  { %710 = vrsqrt.f32 %v364_v11 }
 0x213   :  { %v709_v20 = vpop.eup %708 }
 0x214   :  { %v376_v21 = vmul.f32 %v709_v20, %v374_v19  ;;  %v711_v30 = vpop.eup %710 }
 0x215   :  { %v390_v31 = vmul.f32 %v711_v30, %v364_v11  ;;  %vm396_vm2 = vweird.f32 %v711_v30 }
 0x216   :  { %v377_v22 = vmul.f32 %v709_v20, %v376_v21  ;;  %vm397_vm4 = vmor %vm395_vm3, %vm396_vm2 }
 0x217   :  { %v391_v32 = vmul.f32 %v711_v30, %v390_v31 }
 0x218   :  { %v378_v23 = vmul.f32 0.5, %v377_v22 }
 0x219   :  { %v392_v33 = vmul.f32 0.5, %v391_v32 }
 0x21a   :  { %v379_v24 = vsub.f32 1.5, %v378_v23 }
 0x21b   :  { %v393_v34 = vsub.f32 1.5, %v392_v33 }
 0x21c   :  { %v380_v25 = vmul.f32 %v709_v20, %v379_v24 }
 0x21d   :  { %v394_v35 = vmul.f32 %v711_v30, %v393_v34 }
 0x21e   :  { %v381_v26 = vmul.f32 %v380_v25, %v374_v19 }
 0x21f   :  { %v398_v36 = vsel %vm397_vm4, %v711_v30, %v394_v35 }
 0x220   :  { %v383_v28 = vsel %vm382_vm0, %v374_v19, %v381_v26 }
 0x221   :  { %v386_v29 = vsel %vm384_vm1, %v385_v27, %v383_v28 }
 0x222   :  { %688 = vpush %v386_v29 }
 0x253   :  { %s689_s5 = spop %688 }
 0x254   :  { %s388_s25 = smul.f32 %s689_s5, %s996_s0 }
 0x256   :  { %v399_v37 = vstv %s388_s25 }
 0x257   :  { %v400_v38 = vmul.f32 %v399_v37, %v398_v36 }
 0x259   :  { %v402_v39 = vsub.f32 1.0, %v400_v38 }
 0x25b   :  { %v403_v40 = vmax.f32 %v402_v39, 0.0 }
 0x25d   :  { %v404_v41 = vsel %vm401_vm5, %v403_v40, 0.0 }
 0x25e   :  { %v405_v42 = vmul.f32 %v404_v41, %v360_v8  ;;  %v406_v43 = vmul.f32 %v404_v41, %v361_v7 }
 0x260   :  { %v407_v44 = vpack.c.bf16 %v406_v43, %v405_v42 }
 0x262   :  { %416 = vmatmul.bf16.vlgmr.msrb.gmra.mxu0 %v407_v44  ;;  %430 = vmatmul.bf16.vlgmr.msrb.gmra.mxu1 %v407_v44 }
 0x2df   :  { %v417_v45 = vpop.f32.mrf.mxu0  ;;  %v431_v46 = vpop.f32.mrf.mxu1 }
 0x2e0   :  { %v437_v47 = vmul.f32 -1.0, %v431_v46 }
 0x2e7   :  { %v419_v48 = vpop.f32.mrf.mxu0  ;;  %v433_v49 = vpop.f32.mrf.mxu1 }
 0x2e8   :  { %v439_v50 = vsub.f32 %v419_v48, %v437_v47  ;;  %v438_v51 = vsub.f32 %v417_v45, %v433_v49 }
 0x2ea   :  { %v441_v52 = vsub.f32 %v406_v43, %v439_v50  ;;  %v440_v53 = vsub.f32 %v405_v42, %v438_v51 }
 0x2ec   :  { %v443_v54 = vadd.f32 %v441_v52, %v976_v4  ;;  %v442_v55 = vadd.f32 %v440_v53, %v974_v3 }
 0x2ee   :  { %v445_v56 = vmul.f32 %v443_v54, %v443_v54  ;;  %v444_v57 = vmul.f32 %v442_v55, %v442_v55 }
 0x2f0   :  { %v446_v58 = vadd.f32 %v445_v56, %v444_v57 }
 0x2f2   :  { %447 = vmax.xlane.f32.xlu0 %v446_v58  ;;  %vm477_vm9 = vweird.f32 %v446_v58  ;;  %vm483_vm11 = vcmp.gt.f32.partialorder %v446_v58, 0.0 }
 0x365   :  { %v448_v59 = vpop.xlane.xlu0 %447 }
 0x366   :  { %v449_v60 = vrot.slane %v448_v59, 4 }
 0x368   :  { %v450_v61 = vmax.f32 %v448_v59, %v449_v60 }
 0x36a   :  { %v451_v62 = vrot.slane %v450_v61, 2 }
 0x36c   :  { %v452_v63 = vmax.f32 %v450_v61, %v451_v62 }
 0x36e   :  { %v453_v0 = vrot.slane %v452_v63, 1 }
 0x370   :  { %v454_v1 = vmax.f32 %v452_v63, %v453_v0 }
 0x372   :  { %690 = vpush %v454_v1 }
 0x3a3   :  { %s691_s26 = spop %690 }
 0x3a4   :  { %v456_v2 = vstv %s691_s26 }
 0x3a5   :  { %712 = vrsqrt.f32 %v456_v2  ;;  %vm464_vm6 = vcmp.eq.f32.partialorder %v456_v2, inf  ;;  %v467_v12 = vand.u32 2147483648, %v456_v2  ;;  %vm466_vm7 = vcmp.eq.f32.partialorder %v456_v2, 0.0 }
 0x3a6   :  { %714 = vrsqrt.f32 %v446_v58 }
 0x3ab   :  { %v713_v5 = vpop.eup %712 }
 0x3ac   :  { %v458_v6 = vmul.f32 %v713_v5, %v456_v2  ;;  %v715_v15 = vpop.eup %714 }
 0x3ad   :  { %v472_v16 = vmul.f32 %v715_v15, %v446_v58  ;;  %vm478_vm8 = vweird.f32 %v715_v15 }
 0x3ae   :  { %v459_v7 = vmul.f32 %v713_v5, %v458_v6  ;;  %vm479_vm10 = vmor %vm477_vm9, %vm478_vm8 }
 0x3af   :  { %v473_v17 = vmul.f32 %v715_v15, %v472_v16 }
 0x3b0   :  { %v460_v8 = vmul.f32 0.5, %v459_v7 }
 0x3b1   :  { %v474_v18 = vmul.f32 0.5, %v473_v17 }
 0x3b2   :  { %v461_v9 = vsub.f32 1.5, %v460_v8 }
 0x3b3   :  { %v475_v19 = vsub.f32 1.5, %v474_v18 }
 0x3b4   :  { %v462_v10 = vmul.f32 %v713_v5, %v461_v9 }
 0x3b5   :  { %v476_v20 = vmul.f32 %v715_v15, %v475_v19 }
 0x3b6   :  { %v463_v11 = vmul.f32 %v462_v10, %v456_v2 }
 0x3b7   :  { %v480_v21 = vsel %vm479_vm10, %v715_v15, %v476_v20 }
 0x3b8   :  { %v465_v13 = vsel %vm464_vm6, %v456_v2, %v463_v11 }
 0x3b9   :  { %v468_v14 = vsel %vm466_vm7, %v467_v12, %v465_v13 }
 0x3ba   :  { %692 = vpush %v468_v14 }
 0x3eb   :  { %s693_s27 = spop %692 }
 0x3ec   :  { %s470_s30 = smul.f32 %s693_s27, %s996_s0 }
 0x3ee   :  { %v481_v22 = vstv %s470_s30 }
 0x3ef   :  { %v482_v23 = vmul.f32 %v481_v22, %v480_v21 }
 0x3f1   :  { %v484_v24 = vsub.f32 1.0, %v482_v23 }
 0x3f3   :  { %v485_v25 = vmax.f32 %v484_v24, 0.0 }
 0x3f5   :  { %v486_v26 = vsel %vm483_vm11, %v485_v25, 0.0 }
 0x3f6   :  { %v487_v27 = vmul.f32 %v486_v26, %v442_v55  ;;  %v488_v28 = vmul.f32 %v486_v26, %v443_v54 }
 0x3f8   :  { %v489_v29 = vpack.c.bf16 %v488_v28, %v487_v27 }
 0x3fa   :  { %498 = vmatmul.bf16.vlgmr.msrb.gmra.mxu2 %v489_v29  ;;  %512 = vmatmul.bf16.vlgmr.msrb.gmra.mxu3 %v489_v29 }
 0x47d   :  { %v499_v30 = vpop.f32.mrf.mxu2  ;;  %v513_v31 = vpop.f32.mrf.mxu3 }
 0x47e   :  { %v519_v32 = vmul.f32 -1.0, %v513_v31 }
 0x485   :  { %v501_v33 = vpop.f32.mrf.mxu2  ;;  %v515_v34 = vpop.f32.mrf.mxu3 }
 0x486   :  { %v521_v35 = vsub.f32 %v501_v33, %v519_v32  ;;  %v520_v36 = vsub.f32 %v499_v30, %v515_v34 }
 0x488   :  { %v523_v37 = vsub.f32 %v488_v28, %v521_v35  ;;  %v522_v38 = vsub.f32 %v487_v27, %v520_v36 }
 0x48a   :  { %v525_v39 = vadd.f32 %v523_v37, %v976_v4  ;;  %v524_v40 = vadd.f32 %v522_v38, %v974_v3 }
 0x48c   :  { %v527_v41 = vmul.f32 %v525_v39, %v525_v39  ;;  %v526_v42 = vmul.f32 %v524_v40, %v524_v40 }
 0x48e   :  { %v528_v43 = vadd.f32 %v527_v41, %v526_v42 }
 0x490   :  { %529 = vmax.xlane.f32.xlu1 %v528_v43  ;;  %vm559_vm15 = vweird.f32 %v528_v43  ;;  %vm565_vm1 = vcmp.gt.f32.partialorder %v528_v43, 0.0 }
 0x503   :  { %v530_v44 = vpop.xlane.xlu1 %529 }
 0x504   :  { %v531_v45 = vrot.slane %v530_v44, 4 }
 0x506   :  { %v532_v46 = vmax.f32 %v530_v44, %v531_v45 }
 0x508   :  { %v533_v47 = vrot.slane %v532_v46, 2 }
 0x50a   :  { %v534_v48 = vmax.f32 %v532_v46, %v533_v47 }
 0x50c   :  { %v535_v49 = vrot.slane %v534_v48, 1 }
 0x50e   :  { %v536_v50 = vmax.f32 %v534_v48, %v535_v49 }
 0x510   :  { %694 = vpush %v536_v50 }
 0x541   :  { %s695_s7 = spop %694 }
 0x542   :  { %v538_v51 = vstv %s695_s7 }
 0x543   :  { %716 = vrsqrt.f32 %v538_v51  ;;  %vm546_vm12 = vcmp.eq.f32.partialorder %v538_v51, inf  ;;  %v549_v57 = vand.u32 2147483648, %v538_v51  ;;  %vm548_vm13 = vcmp.eq.f32.partialorder %v538_v51, 0.0 }
 0x544   :  { %718 = vrsqrt.f32 %v528_v43 }
 0x549   :  { %v717_v52 = vpop.eup %716 }
 0x54a   :  { %v540_v53 = vmul.f32 %v717_v52, %v538_v51  ;;  %v719_v60 = vpop.eup %718 }
 0x54b   :  { %v554_v61 = vmul.f32 %v719_v60, %v528_v43  ;;  %vm560_vm14 = vweird.f32 %v719_v60 }
 0x54c   :  { %v541_v4 = vmul.f32 %v717_v52, %v540_v53  ;;  %vm561_vm0 = vmor %vm559_vm15, %vm560_vm14 }
 0x54d   :  { %v555_v62 = vmul.f32 %v719_v60, %v554_v61 }
 0x54e   :  { %v542_v54 = vmul.f32 0.5, %v541_v4 }
 0x54f   :  { %v556_v63 = vmul.f32 0.5, %v555_v62 }
 0x550   :  { %v543_v3 = vsub.f32 1.5, %v542_v54 }
 0x551   :  { %v557_v0 = vsub.f32 1.5, %v556_v63 }
 0x552   :  { %v544_v55 = vmul.f32 %v717_v52, %v543_v3 }
 0x553   :  { %v558_v1 = vmul.f32 %v719_v60, %v557_v0 }
 0x554   :  { %v545_v56 = vmul.f32 %v544_v55, %v538_v51 }
 0x555   :  { %v562_v2 = vsel %vm561_vm0, %v719_v60, %v558_v1 }
 0x556   :  { %v547_v58 = vsel %vm546_vm12, %v538_v51, %v545_v56 }
 0x557   :  { %v550_v59 = vsel %vm548_vm13, %v549_v57, %v547_v58 }
 0x558   :  { %696 = vpush %v550_v59 }
 0x589   :  { %s697_s8 = spop %696 }
 0x58a   :  { %s552_s11 = smul.f32 %s697_s8, %s996_s0  ;;  %s883_s0 = smov [#allocation12]  }
 0x58b   :  { %s592_s2 = sshll.u32 %s883_s0, 4  ;;  %s593_s2 = int_to_ptr.vmem [resolvable:$true] %s592_s2 }
 0x58c   :  { %v563_v5 = vstv %s552_s11 }
 0x58d   :  { %v564_v6 = vmul.f32 %v563_v5, %v562_v2 }
 0x58f   :  { %v566_v7 = vsub.f32 1.0, %v564_v6 }
 0x591   :  { %v567_v8 = vmax.f32 %v566_v7, 0.0 }
 0x593   :  { %v568_v9 = vsel %vm565_vm1, %v567_v8, 0.0 }
 0x594   :  { %v569_v10 = vmul.f32 %v568_v9, %v524_v40  ;;  %v570_v11 = vmul.f32 %v568_v9, %v525_v39 }
 0x596   :  { %v571_v12 = vmul.f32 %v569_v10, %v569_v10  ;;  %v572_v13 = vmul.f32 %v570_v11, %v570_v11 }
 0x598   :  { %v573_v14 = vadd.f32 %v572_v13, %v571_v12 }
 0x59a   :  { %720 = vrsqrt.f32 %v573_v14  ;;  %vm581_vm2 = vcmp.eq.f32.partialorder %v573_v14, inf  ;;  %v584_v22 = vand.u32 2147483648, %v573_v14  ;;  %vm583_vm3 = vcmp.eq.f32.partialorder %v573_v14, 0.0 }
 0x5a0   :  { %v721_v15 = vpop.eup %720 }
 0x5a1   :  { %v575_v16 = vmul.f32 %v721_v15, %v573_v14 }
 0x5a3   :  { %v576_v17 = vmul.f32 %v721_v15, %v575_v16 }
 0x5a5   :  { %v577_v18 = vmul.f32 0.5, %v576_v17 }
 0x5a7   :  { %v578_v19 = vsub.f32 1.5, %v577_v18 }
 0x5a9   :  { %v579_v20 = vmul.f32 %v721_v15, %v578_v19 }
 0x5ab   :  { %v580_v21 = vmul.f32 %v579_v20, %v573_v14 }
 0x5ad   :  { %v582_v23 = vsel %vm581_vm2, %v573_v14, %v580_v21 }
 0x5ae   :  { %v585_v24 = vsel %vm583_vm3, %v584_v22, %v582_v23 }
 0x5af   :  { %586 = vst [vmem:[#allocation12] sm:$0xff] %v585_v24 }
 0x5b0   :  { %597 = dma.vmem_to_hbm [thread:$0]  %s593_s2, 128, %s595_s14, [#allocation5]  }
 0x5b1   :  { %872 = dma.done.wait [#allocation5], 128  }
 0x5b2   :  { %873 = vsyncadd [#allocation5], 4294967168 }
 0x5b3   :  { %602 = vsyncpa [#allocation4], 1 }
 0x5b4   :  { %603 = vsyncpa [#allocation7], 1 }
 0x5b5   :  { %604 = vsyncpa [#allocation10], 1 }
 0x5b6   :  { %605 = vsyncpa [#allocation5], 1 }

</bundles_post_ra>
